<compile_context>
chip_gen: v6e
topology: v6e:2x2x1
jax: 0.10.0
libtpu: 0.0.40
codegen_flags: <defaults>
</compile_context>

<pallas_src>
import functools

import jax
import jax.numpy as jnp
from jax import lax
from jax.experimental import pallas as pl
from jax.experimental.pallas import tpu as pltpu


# ------------------ fused kernel: conv + GAP + projection + binarize + sim + argmax ------------------
def _hd_fused_kernel(patch_ref, w_ref, b_ref, proj_ref, chv_ref,
                     hv_ref, sim_ref, pred_ref, *,
                     hw, inv_hw, binary, binarize_type):
    # patch_ref: (TB, HW, KKC)   bf16 im2col patches for TB images
    # w_ref:     (KKC, Cp)       bf16 conv taps as one matmul matrix (Cout lane-padded to Cp)
    # b_ref:     (1, Cp)         f32 bias (lane-padded)
    # proj_ref:  (Coutp, D)      bf16 random projection (Cout padded only to a multiple of 8)
    # chv_ref:   (D, C)          class hypervectors, pre-transposed (contract on sublanes)
    # hv_ref:    (TB, D)         output hypervectors
    # sim_ref:   (TB, C)         similarity scores
    # pred_ref:  (TB, 1)         argmax class index
    tb = patch_ref.shape[0]
    kkc = patch_ref.shape[-1]
    cp = w_ref.shape[-1]
    coutp = proj_ref.shape[0]

    # --- convolution as a single im2col contraction (bf16 operands, f32 accumulation) ---
    patches = patch_ref[...].reshape(tb * hw, kkc)                   # merge leading dims, no relayout
    feat = jnp.dot(patches, w_ref[...],
                   preferred_element_type=jnp.float32)               # (TB*HW, Cp)
    feat = jnp.maximum(feat + b_ref[...], 0.0)                       # bias + ReLU

    # --- global average pool over the spatial dim ---
    pooled = jnp.sum(feat.reshape(tb, hw, cp), axis=1) * inv_hw      # (TB, Cp)

    # --- random projection + binarization ---
    z = jnp.dot(pooled[:, :coutp].astype(proj_ref.dtype), proj_ref[...],
                preferred_element_type=jnp.float32)                  # (TB, D)
    if binary:
        if binarize_type:      # sign binarization -> {-1, +1}
            hv = jnp.where(z >= 0.0, 1.0, -1.0)
        else:                  # hard threshold -> {0, 1}
            hv = jnp.where(z >= 0.0, 1.0, 0.0)
    else:
        hv = z
    hv_ref[...] = hv.astype(hv_ref.dtype)

    # --- HD inference: similarity against class hypervectors + argmax ---
    sim = jnp.dot(hv.astype(chv_ref.dtype), chv_ref[...],
                  preferred_element_type=jnp.float32)                # (TB, C); exact for +/-1
    sim_ref[...] = sim
    ncls = sim.shape[-1]
    idx = lax.broadcasted_iota(jnp.int32, sim.shape, 1)
    mx = jnp.max(sim, axis=-1, keepdims=True)
    # first index achieving the max (torch argmax semantics)
    pred_ref[...] = jnp.min(jnp.where(sim == mx, idx, ncls),
                            axis=-1, keepdims=True).astype(jnp.int32)


# --------------------------------------- wrapper ---------------------------------------
def hd_forward(x, params, *, binary=True, binarize_type=True, max_batch_tile=8):
    """Equivalent of HD._forward(x) -> (hv, sim, pred).  (pred is int32 vs torch int64.)"""
    conv_w, conv_b = params["conv_w"], params["conv_b"]
    proj, class_hv = params["proj"], params["class_hv"]

    B, Cin, H, W = x.shape
    Cout, Cin2, K, K2 = conv_w.shape
    assert Cin2 == Cin and K2 == K and K % 2 == 1, "odd kernel (SAME padding) expected"
    assert proj.shape[0] == Cout
    pad = K // 2
    HW = H * W
    KKC = K * K * Cin
    Cp = ((Cout + 127) // 128) * 128        # lane-pad conv output so VPU/MXU see full lanes
    Coutp = ((Cout + 7) // 8) * 8           # small sublane pad for the projection operand
    D = proj.shape[1]
    C = class_hv.shape[0]
    assert class_hv.shape[1] == D

    # ---- batch tiling: TB images per grid step (fatter steps, batched matmuls) ----
    if B <= max_batch_tile:
        TB, Bp = B, B                       # single step, block equals full batch dim
    else:
        TB = max_batch_tile
        Bp = ((B + TB - 1) // TB) * TB      # pad batch; padded rows are sliced off below

    # ---- wrapper-side im2col: (B, HW, K*K*Cin) bf16 (lane-dense contraction layout) ----
    x_nhwc = jnp.pad(x.transpose(0, 2, 3, 1),
                     ((0, 0), (pad, pad), (pad, pad), (0, 0)))
    patches = jnp.concatenate(
        [x_nhwc[:, kh:kh + H, kw:kw + W, :] for kh in range(K) for kw in range(K)],
        axis=-1).reshape(B, HW, KKC).astype(jnp.bfloat16)
    if Bp != B:
        patches = jnp.pad(patches, ((0, Bp - B), (0, 0), (0, 0)))

    # ---- conv taps as a single (K*K*Cin, Cp) matmul matrix; row (kh*K+kw)*Cin+ci ----
    w_mat = jnp.pad(conv_w.transpose(2, 3, 1, 0).reshape(KKC, Cout),
                    ((0, 0), (0, Cp - Cout))).astype(jnp.bfloat16)
    b_row = jnp.pad(conv_b.reshape(1, Cout),
                    ((0, 0), (0, Cp - Cout))).astype(jnp.float32)
    # small projection operand: (Coutp, D), NOT zero-padded to 128 rows
    proj_dtype = jnp.bfloat16 if binary else jnp.float32
    proj_p = jnp.pad(proj, ((0, Coutp - Cout), (0, 0))).astype(proj_dtype)
    # class hypervectors pre-transposed once in the wrapper (frozen parameter)
    chv_dtype = jnp.bfloat16 if binary else jnp.float32   # +/-1 exact in bf16
    chv_t = class_hv.T.astype(chv_dtype)

    out_dtype = jnp.bfloat16 if binary else jnp.float32
    kern = functools.partial(_hd_fused_kernel, hw=HW, inv_hw=1.0 / HW,
                             binary=binary, binarize_type=binarize_type)

    hv, sim, pred = pl.pallas_call(
        kern,
        out_shape=(jax.ShapeDtypeStruct((Bp, D), out_dtype),
                   jax.ShapeDtypeStruct((Bp, C), jnp.float32),
                   jax.ShapeDtypeStruct((Bp, 1), jnp.int32)),
        grid_spec=pltpu.PrefetchScalarGridSpec(
            num_scalar_prefetch=0,
            grid=(Bp // TB,),                                   # TB images per grid step
            in_specs=[pl.BlockSpec((TB, HW, KKC), lambda i: (i, 0, 0)),
                      pl.BlockSpec((KKC, Cp), lambda i: (0, 0)),    # constant-index: fetched once
                      pl.BlockSpec((1, Cp), lambda i: (0, 0)),
                      pl.BlockSpec((Coutp, D), lambda i: (0, 0)),
                      pl.BlockSpec((D, C), lambda i: (0, 0))],
            out_specs=[pl.BlockSpec((TB, D), lambda i: (i, 0)),
                       pl.BlockSpec((TB, C), lambda i: (i, 0)),
                       pl.BlockSpec((TB, 1), lambda i: (i, 0))],
        ),
        compiler_params=pltpu.CompilerParams(
            dimension_semantics=("parallel",),                  # shard batch tiles across TCs (v7x)
            vmem_limit_bytes=32 * 1024 * 1024),
    )(patches, w_mat, b_row, proj_p, chv_t)

    hv, sim, pred = hv[:B], sim[:B], pred[:B, 0]
    assert sim.ndim == 2, f"sim_score should be 2D but got {sim.shape}"
    return hv, sim, pred


# --------------------------------------- main ---------------------------------------
if __name__ == "__main__":
    B, Cin, H, W = 2, 4, 16, 16
    Cout, K = 8, 3
    D_HV, N_CLASSES = 1024, 10

    root = jax.random.PRNGKey(0)
    k_x, k_w, k_b, k_p, k_c = jax.random.split(root, 5)

    params = {
        "conv_w": 0.1 * jax.random.normal(k_w, (Cout, Cin, K, K), jnp.float32),
        "conv_b": 0.1 * jax.random.normal(k_b, (Cout,), jnp.float32),
        "proj": jax.random.normal(k_p, (Cout, D_HV), jnp.float32),
        "class_hv": jnp.where(
            jax.random.normal(k_c, (N_CLASSES, D_HV)) >= 0.0, 1.0, -1.0
        ).astype(jnp.float32),
    }

    x = jax.random.normal(k_x, (B, Cin, H, W), jnp.float32)

    fwd = jax.jit(functools.partial(hd_forward, binary=True, binarize_type=True))
    hv, sim, pred = fwd(x, params)
    jax.block_until_ready(pred)

    # ---- sanity checks against a pure-JAX f32 reference of the same pipeline ----
    conv_ref = lax.conv_general_dilated(
        x, params["conv_w"], (1, 1), "SAME",
        dimension_numbers=("NCHW", "OIHW", "NCHW"))
    conv_ref = jnp.maximum(conv_ref + params["conv_b"][None, :, None, None], 0.0)
    feat_ref = conv_ref.mean(axis=(2, 3))
    hv_ref = jnp.where(feat_ref @ params["proj"] >= 0.0, 1.0, -1.0)

    hv_f32 = hv.astype(jnp.float32)
    assert hv.shape == (B, D_HV) and sim.shape == (B, N_CLASSES) and pred.shape == (B,)
    assert pred.dtype == jnp.int32
    # binarized hypervector should agree with the f32 reference almost everywhere
    # (bf16 conv/projection operands only flip signs of near-zero projections)
    assert float(jnp.mean(hv_f32 == hv_ref)) > 0.98
    # similarity matches a plain f32 matmul on the kernel-produced hv (exact: +/-1 inputs)
    assert jnp.allclose(sim, hv_f32 @ params["class_hv"].T, atol=1e-3)
    # in-kernel argmax matches jnp.argmax of the kernel similarity scores
    assert bool(jnp.all(pred == jnp.argmax(sim, axis=-1)))

    print("KERNEL_OK")
</pallas_src>

<mosaic_0001>
module attributes {stable_mosaic.version = 11 : i64} {
  func.func @_hd_fused_kernel(%arg0: i32, %arg1: memref<2x256x36xbf16, #tpu.memory_space<vmem>>, %arg2: memref<36x128xbf16, #tpu.memory_space<vmem>>, %arg3: memref<1x128xf32, #tpu.memory_space<vmem>>, %arg4: memref<8x1024xbf16, #tpu.memory_space<vmem>>, %arg5: memref<1024x10xbf16, #tpu.memory_space<vmem>>, %arg6: memref<2x1024xbf16, #tpu.memory_space<vmem>>, %arg7: memref<2x10xf32, #tpu.memory_space<vmem>>, %arg8: memref<2x1xi32, #tpu.memory_space<vmem>>) attributes {dimension_semantics = [#tpu.dimension_semantics<parallel>], iteration_bounds = array<i64: 1>, scalar_prefetch = 0 : i64, scratch_operands = 0 : i64, tpu.core_type = #tpu.core_type<tc>, window_params = [{transform_indices = @transform_0, window_bounds = array<i64: 2, 256, 36>}, {pipeline_mode = #tpu.pipeline_mode<synchronous>, transform_indices = @transform_1, window_bounds = array<i64: 36, 128>}, {pipeline_mode = #tpu.pipeline_mode<synchronous>, transform_indices = @transform_2, window_bounds = array<i64: 1, 128>}, {pipeline_mode = #tpu.pipeline_mode<synchronous>, transform_indices = @transform_3, window_bounds = array<i64: 8, 1024>}, {pipeline_mode = #tpu.pipeline_mode<synchronous>, transform_indices = @transform_4, window_bounds = array<i64: 1024, 10>}, {transform_indices = @transform_5, window_bounds = array<i64: 2, 1024>}, {transform_indices = @transform_6, window_bounds = array<i64: 2, 10>}, {transform_indices = @transform_7, window_bounds = array<i64: 2, 1>}]} {
    %c0 = arith.constant 0 : index
    %c0_0 = arith.constant 0 : index
    %c0_1 = arith.constant 0 : index
    %0 = vector.load %arg1[%c0, %c0_0, %c0_1] : memref<2x256x36xbf16, #tpu.memory_space<vmem>>, vector<2x256x36xbf16>
    %1 = vector.shape_cast %0 : vector<2x256x36xbf16> to vector<512x36xbf16>
    %c0_2 = arith.constant 0 : index
    %c0_3 = arith.constant 0 : index
    %2 = vector.load %arg2[%c0_2, %c0_3] : memref<36x128xbf16, #tpu.memory_space<vmem>>, vector<36x128xbf16>
    %cst = arith.constant dense<0.000000e+00> : vector<512x128xf32>
    %3 = tpu.matmul %1, %2, %cst {dimension_numbers = #tpu.dot_dimension_numbers<[1], [0], [0], [1], [0, 0, 1, 1], [], []>} : vector<512x36xbf16>, vector<36x128xbf16>, vector<512x128xf32> -> vector<512x128xf32>
    %c0_4 = arith.constant 0 : index
    %c0_5 = arith.constant 0 : index
    %4 = vector.load %arg3[%c0_4, %c0_5] : memref<1x128xf32, #tpu.memory_space<vmem>>, vector<1x128xf32>
    %5 = vector.broadcast %4 : vector<1x128xf32> to vector<512x128xf32>
    %6 = arith.addf %3, %5 : vector<512x128xf32>
    %cst_6 = arith.constant 0.000000e+00 : f32
    %7 = vector.broadcast %cst_6 : f32 to vector<512x128xf32>
    %8 = arith.maximumf %6, %7 : vector<512x128xf32>
    %9 = vector.shape_cast %8 : vector<512x128xf32> to vector<2x256x128xf32>
    %cst_7 = arith.constant dense<0.000000e+00> : vector<2x128xf32>
    %10 = vector.multi_reduction <add>, %9, %cst_7 [1] : vector<2x256x128xf32> to vector<2x128xf32>
    %cst_8 = arith.constant 3.906250e-03 : f32
    %11 = vector.broadcast %cst_8 : f32 to vector<2x128xf32>
    %12 = arith.mulf %10, %11 : vector<2x128xf32>
    %13 = vector.extract_strided_slice %12 {offsets = [0, 0], sizes = [2, 8], strides = [1, 1]} : vector<2x128xf32> to vector<2x8xf32>
    %14 = arith.truncf %13 : vector<2x8xf32> to vector<2x8xbf16>
    %c0_9 = arith.constant 0 : index
    %c0_10 = arith.constant 0 : index
    %15 = vector.load %arg4[%c0_9, %c0_10] : memref<8x1024xbf16, #tpu.memory_space<vmem>>, vector<8x1024xbf16>
    %cst_11 = arith.constant dense<0.000000e+00> : vector<2x1024xf32>
    %16 = tpu.matmul %14, %15, %cst_11 {dimension_numbers = #tpu.dot_dimension_numbers<[1], [0], [0], [1], [0, 0, 1, 1], [], []>} : vector<2x8xbf16>, vector<8x1024xbf16>, vector<2x1024xf32> -> vector<2x1024xf32>
    %cst_12 = arith.constant 0.000000e+00 : f32
    %17 = vector.broadcast %cst_12 : f32 to vector<2x1024xf32>
    %18 = arith.cmpf oge, %16, %17 : vector<2x1024xf32>
    %cst_13 = arith.constant 1.000000e+00 : f32
    %cst_14 = arith.constant -1.000000e+00 : f32
    %19 = vector.broadcast %cst_13 : f32 to vector<2x1024xf32>
    %20 = vector.broadcast %cst_14 : f32 to vector<2x1024xf32>
    %21 = arith.select %18, %19, %20 : vector<2x1024xi1>, vector<2x1024xf32>
    %22 = arith.truncf %21 : vector<2x1024xf32> to vector<2x1024xbf16>
    %c0_15 = arith.constant 0 : index
    %c0_16 = arith.constant 0 : index
    %23 = vector.load %arg6[%c0_15, %c0_16] : memref<2x1024xbf16, #tpu.memory_space<vmem>>, vector<2x1024xbf16>
    tpu.vector_store %arg6[%c0_15, %c0_16], %22 {strides = array<i32>} : memref<2x1024xbf16, #tpu.memory_space<vmem>>, vector<2x1024xbf16>,
    %24 = arith.truncf %21 : vector<2x1024xf32> to vector<2x1024xbf16>
    %c0_17 = arith.constant 0 : index
    %c0_18 = arith.constant 0 : index
    %25 = vector.load %arg5[%c0_17, %c0_18] : memref<1024x10xbf16, #tpu.memory_space<vmem>>, vector<1024x10xbf16>
    %cst_19 = arith.constant dense<0.000000e+00> : vector<2x10xf32>
    %26 = tpu.matmul %24, %25, %cst_19 {dimension_numbers = #tpu.dot_dimension_numbers<[1], [0], [0], [1], [0, 0, 1, 1], [], []>} : vector<2x1024xbf16>, vector<1024x10xbf16>, vector<2x10xf32> -> vector<2x10xf32>
    %c0_20 = arith.constant 0 : index
    %c0_21 = arith.constant 0 : index
    %27 = vector.load %arg7[%c0_20, %c0_21] : memref<2x10xf32, #tpu.memory_space<vmem>>, vector<2x10xf32>
    tpu.vector_store %arg7[%c0_20, %c0_21], %26 {strides = array<i32>} : memref<2x10xf32, #tpu.memory_space<vmem>>, vector<2x10xf32>,
    %28 = tpu.iota {dimensions = array<i32: 1>} : vector<2x10xi32>
    %cst_22 = arith.constant dense<0xFF800000> : vector<2xf32>
    %29 = vector.multi_reduction <maximumf>, %26, %cst_22 [1] : vector<2x10xf32> to vector<2xf32>
    %30 = vector.shape_cast %29 : vector<2xf32> to vector<2x1xf32>
    %31 = vector.broadcast %30 : vector<2x1xf32> to vector<2x10xf32>
    %32 = arith.cmpf oeq, %26, %31 : vector<2x10xf32>
    %c10_i32 = arith.constant 10 : i32
    %33 = vector.broadcast %c10_i32 : i32 to vector<2x10xi32>
    %34 = arith.select %32, %28, %33 : vector<2x10xi1>, vector<2x10xi32>
    %cst_23 = arith.constant dense<2147483647> : vector<2xi32>
    %35 = vector.multi_reduction <minsi>, %34, %cst_23 [1] : vector<2x10xi32> to vector<2xi32>
    %36 = vector.shape_cast %35 : vector<2xi32> to vector<2x1xi32>
    %c0_24 = arith.constant 0 : index
    %c0_25 = arith.constant 0 : index
    %37 = vector.load %arg8[%c0_24, %c0_25] : memref<2x1xi32, #tpu.memory_space<vmem>>, vector<2x1xi32>
    tpu.vector_store %arg8[%c0_24, %c0_25], %36 {strides = array<i32>} : memref<2x1xi32, #tpu.memory_space<vmem>>, vector<2x1xi32>,
    return
  }
  func.func @transform_0(%arg0: i32) -> (i32, i32, i32) {
    %c0_i32 = arith.constant 0 : i32
    %c0_i32_0 = arith.constant 0 : i32
    %c0_i32_1 = arith.constant 0 : i32
    return %arg0, %c0_i32, %c0_i32_0 : i32, i32, i32
  }
  func.func @transform_1(%arg0: i32) -> (i32, i32) {
    %c0_i32 = arith.constant 0 : i32
    %c0_i32_0 = arith.constant 0 : i32
    %c0_i32_1 = arith.constant 0 : i32
    return %c0_i32, %c0_i32_0 : i32, i32
  }
  func.func @transform_2(%arg0: i32) -> (i32, i32) {
    %c0_i32 = arith.constant 0 : i32
    %c0_i32_0 = arith.constant 0 : i32
    %c0_i32_1 = arith.constant 0 : i32
    return %c0_i32, %c0_i32_0 : i32, i32
  }
  func.func @transform_3(%arg0: i32) -> (i32, i32) {
    %c0_i32 = arith.constant 0 : i32
    %c0_i32_0 = arith.constant 0 : i32
    %c0_i32_1 = arith.constant 0 : i32
    return %c0_i32, %c0_i32_0 : i32, i32
  }
  func.func @transform_4(%arg0: i32) -> (i32, i32) {
    %c0_i32 = arith.constant 0 : i32
    %c0_i32_0 = arith.constant 0 : i32
    %c0_i32_1 = arith.constant 0 : i32
    return %c0_i32, %c0_i32_0 : i32, i32
  }
  func.func @transform_5(%arg0: i32) -> (i32, i32) {
    %c0_i32 = arith.constant 0 : i32
    %c0_i32_0 = arith.constant 0 : i32
    return %arg0, %c0_i32 : i32, i32
  }
  func.func @transform_6(%arg0: i32) -> (i32, i32) {
    %c0_i32 = arith.constant 0 : i32
    %c0_i32_0 = arith.constant 0 : i32
    return %arg0, %c0_i32 : i32, i32
  }
  func.func @transform_7(%arg0: i32) -> (i32, i32) {
    %c0_i32 = arith.constant 0 : i32
    %c0_i32_0 = arith.constant 0 : i32
    return %arg0, %c0_i32 : i32, i32
  }
}

</mosaic_0001>

<bundles_post_ra>
// kernel: hd_forward.1
= control target key start
LH: loop header
LB: loop body
LE: loop exit
PB: predicated region body
PF: predicated region fallthrough
CT: control target
= control target key end

     0   :  { %13 = vsyncpa [#allocation3], 0  ;;  %vm374_vm0 = vcmask 1041408   ;;  %vm277_vm1 = vcmask 293888   ;;  %s2863_s0 = inlined_call_operand.vmem [shape: bf16[2,256,36], index: 0, kind: input, shape index: {}]   ;;  %s2864_s1 = inlined_call_operand.vmem [shape: bf16[36,128], index: 1, kind: input, shape index: {}]   ;;  %s2865_s2 = inlined_call_operand.vmem [shape: f32[1,128], index: 2, kind: input, shape index: {}]   ;;  %s2866_s3 = inlined_call_operand.vmem [shape: bf16[8,1024], index: 3, kind: input, shape index: {}]   ;;  %s2867_s4 = inlined_call_operand.vmem [shape: bf16[1024,10], index: 4, kind: input, shape index: {}]   ;;  %s2868_s5 = inlined_call_operand.hbm [shape: bf16[2,1024], index: 5, kind: output, shape index: {0}]   ;;  %s2869_s6 = inlined_call_operand.hbm [shape: f32[2,10], index: 6, kind: output, shape index: {1}]   ;;  %s2870_s7 = inlined_call_operand.vmem [shape: s32[2,1], index: 7, kind: output, shape index: {2}]  }
   0x1   :  { %v2197_v0 = vld [vmem:[%s2864_s1 + $0x10] ss:$0 sps:$4 sm:$0x33]   ;;  %v2198_v1 = vld [vmem:[%s2864_s1 + $0x8] sm:$0xff]   ;;  %v2200_v3 = vld [vmem:[%s2863_s0] sm:$0xff]  }
   0x2   :  { %2191 = vmatprep.subr.msk.bf16.mxu0 %vm374_vm0, %v2197_v0  ;;  %v376_v2 = vsel %vm374_vm0, %v2197_v0, 0  ;;  %v2199_v4 = vld [vmem:[%s2864_s1] sm:$0xff]   ;;  %2127 = vmatprep.mubr.msk.bf16.mxu0 %vm277_vm1, %v2200_v3  ;;  %v2201_v5 = vld [vmem:[%s2863_s0 + $0x8] sm:$0xff]   ;;  %v2202_v6 = vld [vmem:[%s2863_s0 + $0x10] sm:$0xff]  }
   0x3   :  { %2122 = vmatpush3.bf16.msra.mxu0 %v376_v2  ;;  %v2203_v7 = vld [vmem:[%s2863_s0 + $0x18] sm:$0xff]   ;;  %v2204_v8 = vld [vmem:[%s2863_s0 + $0x20] sm:$0xff]   ;;  %v2205_v9 = vld [vmem:[%s2863_s0 + $0x28] sm:$0xff]  }
   0x4   :  { %2123 = vmatprep.subr.bf16.mxu0 %v2198_v1  ;;  %v2206_v10 = vld [vmem:[%s2863_s0 + $0x30] sm:$0xff]   ;;  %v2207_v11 = vld [vmem:[%s2863_s0 + $0x38] sm:$0xff]   ;;  %v2208_v12 = vld [vmem:[%s2863_s0 + $0x40] sm:$0xff]  }
   0x5   :  { %v2209_v13 = vld [vmem:[%s2863_s0 + $0x48] sm:$0xff]   ;;  %v2210_v14 = vld [vmem:[%s2863_s0 + $0x50] sm:$0xff]   ;;  %v2211_v15 = vld [vmem:[%s2863_s0 + $0x58] sm:$0xff]  }
   0x6   :  { %v2212_v16 = vld [vmem:[%s2863_s0 + $0x60] sm:$0xff]   ;;  %v2213_v17 = vld [vmem:[%s2863_s0 + $0x68] sm:$0xff]   ;;  %v2214_v18 = vld [vmem:[%s2863_s0 + $0x70] sm:$0xff]  }
   0x7   :  { %2124 = vmatpush3.bf16.msra.mxu0 %v2198_v1  ;;  %v2215_v19 = vld [vmem:[%s2863_s0 + $0x78] sm:$0xff]   ;;  %v2216_v20 = vld [vmem:[%s2863_s0 + $0x80] sm:$0xff]   ;;  %v2217_v21 = vld [vmem:[%s2863_s0 + $0x88] sm:$0xff]  }
   0x8   :  { %2125 = vmatprep.subr.bf16.mxu0 %v2199_v4  ;;  %v2218_v22 = vld [vmem:[%s2863_s0 + $0x90] sm:$0xff]  }
   0xb   :  { %2126 = vmatpush3.bf16.msra.mxu0 %v2199_v4 }
   0xe   :  { %2128 = vmatmul.mubr.msk.bf16.vlgmr.msra.gmra.mxu0 %vm277_vm1, %v2201_v5 }
   0xf   :  { %2131 = vmatprep.mubr.msk.bf16.mxu0 %vm277_vm1, %v2202_v6 }
  0x16   :  { %2132 = vmatmul.mubr.msk.bf16.gmra.mxu0 %vm277_vm1, %v2203_v7 }
  0x17   :  { %2135 = vmatprep.mubr.msk.bf16.mxu0 %vm277_vm1, %v2204_v8 }
  0x1e   :  { %2136 = vmatmul.mubr.msk.bf16.gmra.mxu0 %vm277_vm1, %v2205_v9 }
  0x1f   :  { %2139 = vmatprep.mubr.msk.bf16.mxu0 %vm277_vm1, %v2206_v10 }
  0x26   :  { %2140 = vmatmul.mubr.msk.bf16.gmra.mxu0 %vm277_vm1, %v2207_v11 }
  0x27   :  { %2143 = vmatprep.mubr.msk.bf16.mxu0 %vm277_vm1, %v2208_v12 }
  0x2e   :  { %2144 = vmatmul.mubr.msk.bf16.gmra.mxu0 %vm277_vm1, %v2209_v13 }
  0x2f   :  { %2147 = vmatprep.mubr.msk.bf16.mxu0 %vm277_vm1, %v2210_v14 }
  0x36   :  { %2148 = vmatmul.mubr.msk.bf16.gmra.mxu0 %vm277_vm1, %v2211_v15 }
  0x37   :  { %2151 = vmatprep.mubr.msk.bf16.mxu0 %vm277_vm1, %v2212_v16 }
  0x3e   :  { %2152 = vmatmul.mubr.msk.bf16.gmra.mxu0 %vm277_vm1, %v2213_v17 }
  0x3f   :  { %2155 = vmatprep.mubr.msk.bf16.mxu0 %vm277_vm1, %v2214_v18 }
  0x46   :  { %2156 = vmatmul.mubr.msk.bf16.gmra.mxu0 %vm277_vm1, %v2215_v19 }
  0x47   :  { %2159 = vmatprep.mubr.msk.bf16.mxu0 %vm277_vm1, %v2216_v20 }
  0x48   :  { %14 = vsyncpa [#allocation5], 0  ;;  %v2219_v23 = vld [vmem:[%s2863_s0 + $0x98] sm:$0xff]   ;;  %v2220_v24 = vld [vmem:[%s2863_s0 + $0xa0] sm:$0xff]   ;;  %vm844_vm2 = vcmask 1043456   ;;  %v2348_v10 = vmov 0  }
  0x49   :  { %v2221_v25 = vld [vmem:[%s2863_s0 + $0xa8] sm:$0xff]   ;;  %v2222_v26 = vld [vmem:[%s2863_s0 + $0xb0] sm:$0xff]   ;;  %v2223_v27 = vld [vmem:[%s2863_s0 + $0xb8] sm:$0xff]   ;;  %901 = vmatprep.mubr.bf16.mxu1 %v2348_v10  ;;  %vm817_vm3 = vcmask 1041409   ;;  %vm840_vm4 = vcmask 64512   ;;  %vm1788_vm13 = vcmask 74752  }
  0x4a   :  { %v2224_v28 = vld [vmem:[%s2863_s0 + $0xc0] sm:$0xff]   ;;  %v2225_v29 = vld [vmem:[%s2863_s0 + $0xc8] sm:$0xff]   ;;  %v2226_v30 = vld [vmem:[%s2863_s0 + $0xd0] sm:$0xff]   ;;  %s2352_s24 = smov [#allocation4]  }
  0x4b   :  { %v2227_v31 = vld [vmem:[%s2863_s0 + $0xd8] sm:$0xff]   ;;  %v2228_v32 = vld [vmem:[%s2863_s0 + $0xe0] sm:$0xff]   ;;  %v2229_v33 = vld [vmem:[%s2863_s0 + $0xe8] sm:$0xff]   ;;  %s1830_s25 = sshll.u32 %s2352_s24, 4  ;;  %s1831_s25 = int_to_ptr.vmem [resolvable:$true] %s1830_s25 }
  0x4c   :  { %v2230_v34 = vld [vmem:[%s2863_s0 + $0xf0] sm:$0xff]   ;;  %v2231_v35 = vld [vmem:[%s2863_s0 + $0xf8] sm:$0xff]   ;;  %v2533_v38 = vld [vmem:[%s2865_s2] ss:$0 sm:$0xff] }
  0x4d   :  { %v809_v4 = vld [vmem:[%s2866_s3] sm:$0xff] }
  0x4e   :  { %2160 = vmatmul.mubr.msk.bf16.gmra.mxu0 %vm277_vm1, %v2217_v21  ;;  %v1915_v6 = vcombine.high %v809_v4, %v809_v4  ;;  %v1914_v7 = vcombine.low %v809_v4, %v809_v4 }
  0x4f   :  { %2163 = vmatprep.mubr.msk.bf16.mxu0 %vm277_vm1, %v2218_v22 }
  0x50   :  { %1922 = vmatprep.subr.msk.bf16.mxu1 %vm844_vm2, %v1915_v6  ;;  %v846_v12 = vsel %vm844_vm2, %v1914_v7, 0 }
  0x51   :  { %884 = vmatpush1.bf16.msra.mxu1 %v846_v12 }
  0x56   :  { %2164 = vmatmul.mubr.msk.bf16.gmra.mxu0 %vm277_vm1, %v2219_v23 }
  0x57   :  { %2167 = vmatprep.mubr.msk.bf16.mxu0 %vm277_vm1, %v2220_v24 }
  0x5e   :  { %2168 = vmatmul.mubr.msk.bf16.gmra.mxu0 %vm277_vm1, %v2221_v25 }
  0x5f   :  { %2171 = vmatprep.mubr.msk.bf16.mxu0 %vm277_vm1, %v2222_v26 }
  0x66   :  { %2172 = vmatmul.mubr.msk.bf16.gmra.mxu0 %vm277_vm1, %v2223_v27 }
  0x67   :  { %2175 = vmatprep.mubr.msk.bf16.mxu0 %vm277_vm1, %v2224_v28 }
  0x6e   :  { %2176 = vmatmul.mubr.msk.bf16.gmra.mxu0 %vm277_vm1, %v2225_v29 }
  0x6f   :  { %2179 = vmatprep.mubr.msk.bf16.mxu0 %vm277_vm1, %v2226_v30  ;;  %v2558_v30 = vld [vmem:[%s2866_s3 + $0x8] sm:$0xff] }
  0x76   :  { %2180 = vmatmul.mubr.msk.bf16.gmra.mxu0 %vm277_vm1, %v2227_v31 }
  0x77   :  { %2183 = vmatprep.mubr.msk.bf16.mxu0 %vm277_vm1, %v2228_v32 }
  0x7e   :  { %2184 = vmatmul.mubr.msk.bf16.gmra.mxu0 %vm277_vm1, %v2229_v33 }
  0x7f   :  { %2187 = vmatprep.mubr.msk.bf16.mxu0 %vm277_vm1, %v2230_v34  ;;  %v1917_v34 = vcombine.high %v2558_v30, %v2558_v30 }
  0x81   :  { %1924 = vmatprep.subr.msk.bf16.mxu1 %vm844_vm2, %v1917_v34 }
  0x86   :  { %2188 = vmatmul.mubr.msk.bf16.gmra.mxu0 %vm277_vm1, %v2231_v35 }
  0xce   :  { %v2129_v36 = vpop.f32.mrf.mxu0 }
  0xcf   :  { %v421_v42 = vadd.f32 %v2129_v36, %v2533_v38 }
  0xd0   :  { %v412_v37 = vpop.f32.mrf.mxu0 }
  0xd1   :  { %v413_v40 = vadd.f32 %v2533_v38, %v412_v37  ;;  %v669_v49 = vmax.f32 %v421_v42, 0.0 }
  0xd2   :  { %v2130_v39 = vpop.f32.mrf.mxu0 }
  0xd3   :  { %v667_v45 = vmax.f32 %v413_v40, 0.0  ;;  %v424_v46 = vadd.f32 %v2130_v39, %v2533_v38 }
  0xd4   :  { %v415_v41 = vpop.f32.mrf.mxu0 }
  0xd5   :  { %v416_v43 = vadd.f32 %v2533_v38, %v415_v41  ;;  %v670_v53 = vmax.f32 %v424_v46, 0.0 }
  0xd6   :  { %v2133_v44 = vpop.f32.mrf.mxu0 }
  0xd7   :  { %v668_v47 = vmax.f32 %v416_v43, 0.0  ;;  %v437_v56 = vadd.f32 %v2133_v44, %v2533_v38 }
  0xd8   :  { %v428_v48 = vpop.f32.mrf.mxu0 }
  0xd9   :  { %v731_v50 = vadd.f32 %v668_v47, %v667_v45  ;;  %v429_v51 = vadd.f32 %v2533_v38, %v428_v48  ;;  %v673_v1 = vmax.f32 %v437_v56, 0.0 }
  0xda   :  { %v2134_v52 = vpop.f32.mrf.mxu0 }
  0xdb   :  { %v732_v54 = vadd.f32 %v731_v50, %v669_v49  ;;  %v671_v57 = vmax.f32 %v429_v51, 0.0  ;;  %v440_v62 = vadd.f32 %v2134_v52, %v2533_v38 }
  0xdc   :  { %v431_v55 = vpop.f32.mrf.mxu0 }
  0xdd   :  { %v733_v58 = vadd.f32 %v732_v54, %v670_v53  ;;  %v432_v59 = vadd.f32 %v2533_v38, %v431_v55  ;;  %v674_v8 = vmax.f32 %v440_v62, 0.0 }
  0xde   :  { %v2137_v60 = vpop.f32.mrf.mxu0 }
  0xdf   :  { %v734_v61 = vadd.f32 %v733_v58, %v671_v57  ;;  %v672_v63 = vmax.f32 %v432_v59, 0.0  ;;  %v453_v13 = vadd.f32 %v2137_v60, %v2533_v38 }
  0xe0   :  { %v444_v0 = vpop.f32.mrf.mxu0 }
  0xe1   :  { %v735_v2 = vadd.f32 %v734_v61, %v672_v63  ;;  %v445_v3 = vadd.f32 %v2533_v38, %v444_v0  ;;  %v677_v22 = vmax.f32 %v453_v13, 0.0 }
  0xe2   :  { %v2138_v5 = vpop.f32.mrf.mxu0 }
  0xe3   :  { %v736_v9 = vadd.f32 %v735_v2, %v673_v1  ;;  %v675_v14 = vmax.f32 %v445_v3, 0.0  ;;  %v456_v19 = vadd.f32 %v2138_v5, %v2533_v38 }
  0xe4   :  { %v447_v11 = vpop.f32.mrf.mxu0 }
  0xe5   :  { %v737_v15 = vadd.f32 %v736_v9, %v674_v8  ;;  %v448_v16 = vadd.f32 %v2533_v38, %v447_v11  ;;  %v678_v26 = vmax.f32 %v456_v19, 0.0  ;;  %v2242_v19 = vld [vmem:[%s2867_s4 + $0x1f0] sm:$0xff]  }
  0xe6   :  { %v2141_v17 = vpop.f32.mrf.mxu0 }
  0xe7   :  { %v738_v18 = vadd.f32 %v737_v15, %v675_v14  ;;  %v676_v20 = vmax.f32 %v448_v16, 0.0  ;;  %v469_v28 = vadd.f32 %v2141_v17, %v2533_v38  ;;  %v2240_v17 = vld [vmem:[%s2867_s4 + $0x1f8] sm:$0xff]  }
  0xe8   :  { %v460_v21 = vpop.f32.mrf.mxu0  ;;  %2099 = vmatprep.subr.bf16.mxu0 %v2240_v17 }
  0xe9   :  { %v739_v23 = vadd.f32 %v738_v18, %v676_v20  ;;  %v461_v24 = vadd.f32 %v2533_v38, %v460_v21  ;;  %v681_v41 = vmax.f32 %v469_v28, 0.0  ;;  %v2241_v18 = vld [vmem:[%s2867_s4 + $0x1b8] sm:$0xff]   ;;  %v2243_v28 = vld [vmem:[%s2867_s4 + $0x1b0] sm:$0xff]  }
  0xea   :  { %v2142_v25 = vpop.f32.mrf.mxu0  ;;  %2100 = vmatpush3.bf16.msra.mxu0 %v2241_v18 }
  0xeb   :  { %v740_v27 = vadd.f32 %v739_v23, %v677_v22  ;;  %v679_v31 = vmax.f32 %v461_v24, 0.0  ;;  %v472_v37 = vadd.f32 %v2142_v25, %v2533_v38  ;;  %2101 = vmatprep.subr.bf16.mxu0 %v2242_v19 }
  0xec   :  { %v463_v29 = vpop.f32.mrf.mxu0 }
  0xed   :  { %v741_v32 = vadd.f32 %v740_v27, %v678_v26  ;;  %v464_v33 = vadd.f32 %v2533_v38, %v463_v29  ;;  %v682_v45 = vmax.f32 %v472_v37, 0.0 }
  0xee   :  { %v2145_v35 = vpop.f32.mrf.mxu0  ;;  %2102 = vmatpush3.bf16.msra.mxu0 %v2243_v28 }
  0xef   :  { %v742_v36 = vadd.f32 %v741_v32, %v679_v31  ;;  %v680_v39 = vmax.f32 %v464_v33, 0.0  ;;  %v485_v48 = vadd.f32 %v2145_v35, %v2533_v38  ;;  %v2246_v31 = vld [vmem:[%s2867_s4 + $0x1e8] sm:$0xff]  }
  0xf0   :  { %v476_v40 = vpop.f32.mrf.mxu0  ;;  %2103 = vmatprep.subr.bf16.mxu0 %v2246_v31 }
  0xf1   :  { %v743_v42 = vadd.f32 %v742_v36, %v680_v39  ;;  %v477_v43 = vadd.f32 %v2533_v38, %v476_v40  ;;  %v685_v57 = vmax.f32 %v485_v48, 0.0  ;;  %v2247_v39 = vld [vmem:[%s2867_s4 + $0x1a8] sm:$0xff]  }
  0xf2   :  { %v2146_v44 = vpop.f32.mrf.mxu0  ;;  %2104 = vmatpush3.bf16.msra.mxu0 %v2247_v39 }
  0xf3   :  { %v744_v46 = vadd.f32 %v743_v42, %v681_v41  ;;  %v683_v49 = vmax.f32 %v477_v43, 0.0  ;;  %v488_v54 = vadd.f32 %v2146_v44, %v2533_v38 }
  0xf4   :  { %v479_v47 = vpop.f32.mrf.mxu0 }
  0xf5   :  { %v745_v50 = vadd.f32 %v744_v46, %v682_v45  ;;  %v480_v51 = vadd.f32 %v2533_v38, %v479_v47  ;;  %v686_v61 = vmax.f32 %v488_v54, 0.0 }
  0xf6   :  { %v2149_v52 = vpop.f32.mrf.mxu0 }
  0xf7   :  { %v746_v53 = vadd.f32 %v745_v50, %v683_v49  ;;  %v684_v55 = vmax.f32 %v480_v51, 0.0  ;;  %v501_v0 = vadd.f32 %v2149_v52, %v2533_v38 }
  0xf8   :  { %v492_v56 = vpop.f32.mrf.mxu0 }
  0xf9   :  { %v747_v58 = vadd.f32 %v746_v53, %v684_v55  ;;  %v493_v59 = vadd.f32 %v2533_v38, %v492_v56  ;;  %v689_v9 = vmax.f32 %v501_v0, 0.0 }
  0xfa   :  { %v2150_v60 = vpop.f32.mrf.mxu0 }
  0xfb   :  { %v748_v62 = vadd.f32 %v747_v58, %v685_v57  ;;  %v687_v1 = vmax.f32 %v493_v59, 0.0  ;;  %v504_v6 = vadd.f32 %v2150_v60, %v2533_v38  ;;  %v2256_v60 = vld [vmem:[%s2867_s4 + $0x1e0] sm:$0xff]  }
  0xfc   :  { %v495_v63 = vpop.f32.mrf.mxu0  ;;  %2105 = vmatprep.subr.bf16.mxu0 %v2256_v60 }
  0xfd   :  { %v749_v2 = vadd.f32 %v748_v62, %v686_v61  ;;  %v496_v3 = vadd.f32 %v2533_v38, %v495_v63  ;;  %v690_v14 = vmax.f32 %v504_v6, 0.0  ;;  %v2257_v61 = vld [vmem:[%s2867_s4 + $0x1a0] sm:$0xff]  }
  0xfe   :  { %v2153_v4 = vpop.f32.mrf.mxu0  ;;  %2106 = vmatpush3.bf16.msra.mxu0 %v2257_v61 }
  0xff   :  { %v750_v5 = vadd.f32 %v749_v2, %v687_v1  ;;  %v688_v7 = vmax.f32 %v496_v3, 0.0  ;;  %v517_v20 = vadd.f32 %v2153_v4, %v2533_v38 }
 0x100   :  { %v508_v8 = vpop.f32.mrf.mxu0 }
 0x101   :  { %v751_v11 = vadd.f32 %v750_v5, %v688_v7  ;;  %v509_v12 = vadd.f32 %v2533_v38, %v508_v8  ;;  %v693_v32 = vmax.f32 %v517_v20, 0.0 }
 0x102   :  { %v2154_v13 = vpop.f32.mrf.mxu0 }
 0x103   :  { %v752_v15 = vadd.f32 %v751_v11, %v689_v9  ;;  %v691_v21 = vmax.f32 %v509_v12, 0.0  ;;  %v520_v26 = vadd.f32 %v2154_v13, %v2533_v38 }
 0x104   :  { %v511_v16 = vpop.f32.mrf.mxu0 }
 0x105   :  { %v753_v22 = vadd.f32 %v752_v15, %v690_v14  ;;  %v512_v23 = vadd.f32 %v2533_v38, %v511_v16  ;;  %v694_v36 = vmax.f32 %v520_v26, 0.0 }
 0x106   :  { %v2157_v24 = vpop.f32.mrf.mxu0 }
 0x107   :  { %v754_v25 = vadd.f32 %v753_v22, %v691_v21  ;;  %v692_v27 = vmax.f32 %v512_v23, 0.0  ;;  %v533_v41 = vadd.f32 %v2157_v24, %v2533_v38 }
 0x108   :  { %v524_v29 = vpop.f32.mrf.mxu0 }
 0x109   :  { %v755_v33 = vadd.f32 %v754_v25, %v692_v27  ;;  %v525_v34 = vadd.f32 %v2533_v38, %v524_v29  ;;  %v697_v50 = vmax.f32 %v533_v41, 0.0 }
 0x10a   :  { %v2158_v35 = vpop.f32.mrf.mxu0 }
 0x10b   :  { %v756_v37 = vadd.f32 %v755_v33, %v693_v32  ;;  %v695_v42 = vmax.f32 %v525_v34, 0.0  ;;  %v536_v47 = vadd.f32 %v2158_v35, %v2533_v38 }
 0x10c   :  { %v527_v40 = vpop.f32.mrf.mxu0 }
 0x10d   :  { %v757_v43 = vadd.f32 %v756_v37, %v694_v36  ;;  %v528_v44 = vadd.f32 %v2533_v38, %v527_v40  ;;  %v698_v53 = vmax.f32 %v536_v47, 0.0 }
 0x10e   :  { %v2161_v45 = vpop.f32.mrf.mxu0 }
 0x10f   :  { %v758_v46 = vadd.f32 %v757_v43, %v695_v42  ;;  %v696_v48 = vmax.f32 %v528_v44, 0.0  ;;  %v549_v58 = vadd.f32 %v2161_v45, %v2533_v38 }
 0x110   :  { %v540_v49 = vpop.f32.mrf.mxu0 }
 0x111   :  { %v759_v51 = vadd.f32 %v758_v46, %v696_v48  ;;  %v541_v55 = vadd.f32 %v2533_v38, %v540_v49  ;;  %v701_v3 = vmax.f32 %v549_v58, 0.0 }
 0x112   :  { %v2162_v52 = vpop.f32.mrf.mxu0 }
 0x113   :  { %v760_v54 = vadd.f32 %v759_v51, %v697_v50  ;;  %v699_v63 = vmax.f32 %v541_v55, 0.0  ;;  %v552_v0 = vadd.f32 %v2162_v52, %v2533_v38 }
 0x114   :  { %v543_v56 = vpop.f32.mrf.mxu0 }
 0x115   :  { %v2600_v57 = vadd.f32 %v760_v54, %v698_v53  ;;  %v544_v59 = vadd.f32 %v2533_v38, %v543_v56  ;;  %v702_v7 = vmax.f32 %v552_v0, 0.0 }
 0x116   :  { %v2165_v62 = vpop.f32.mrf.mxu0 }
 0x117   :  { %v700_v1 = vmax.f32 %v544_v59, 0.0  ;;  %v565_v11 = vadd.f32 %v2165_v62, %v2533_v38 }
 0x118   :  { %v556_v2 = vpop.f32.mrf.mxu0 }
 0x119   :  { %v768_v4 = vadd.f32 %v700_v1, %v699_v63  ;;  %v557_v5 = vadd.f32 %v2533_v38, %v556_v2  ;;  %v705_v20 = vmax.f32 %v565_v11, 0.0 }
 0x11a   :  { %v2166_v6 = vpop.f32.mrf.mxu0 }
 0x11b   :  { %v769_v8 = vadd.f32 %v768_v4, %v701_v3  ;;  %v703_v12 = vmax.f32 %v557_v5, 0.0  ;;  %v568_v17 = vadd.f32 %v2166_v6, %v2533_v38 }
 0x11c   :  { %v559_v9 = vpop.f32.mrf.mxu0 }
 0x11d   :  { %v770_v13 = vadd.f32 %v769_v8, %v702_v7  ;;  %v560_v14 = vadd.f32 %v2533_v38, %v559_v9  ;;  %v706_v24 = vmax.f32 %v568_v17, 0.0 }
 0x11e   :  { %v2169_v15 = vpop.f32.mrf.mxu0 }
 0x11f   :  { %v771_v16 = vadd.f32 %v770_v13, %v703_v12  ;;  %v704_v18 = vmax.f32 %v560_v14, 0.0  ;;  %v581_v27 = vadd.f32 %v2169_v15, %v2533_v38 }
 0x120   :  { %v572_v19 = vpop.f32.mrf.mxu0 }
 0x121   :  { %v772_v21 = vadd.f32 %v771_v16, %v704_v18  ;;  %v573_v22 = vadd.f32 %v2533_v38, %v572_v19  ;;  %v709_v37 = vmax.f32 %v581_v27, 0.0 }
 0x122   :  { %v2170_v23 = vpop.f32.mrf.mxu0 }
 0x123   :  { %v773_v25 = vadd.f32 %v772_v21, %v705_v20  ;;  %v707_v28 = vmax.f32 %v573_v22, 0.0  ;;  %v584_v34 = vadd.f32 %v2170_v23, %v2533_v38 }
 0x124   :  { %v575_v26 = vpop.f32.mrf.mxu0 }
 0x125   :  { %v774_v29 = vadd.f32 %v773_v25, %v706_v24  ;;  %v576_v31 = vadd.f32 %v2533_v38, %v575_v26  ;;  %v710_v42 = vmax.f32 %v584_v34, 0.0 }
 0x126   :  { %v2173_v32 = vpop.f32.mrf.mxu0 }
 0x127   :  { %v775_v33 = vadd.f32 %v774_v29, %v707_v28  ;;  %v708_v35 = vmax.f32 %v576_v31, 0.0  ;;  %v597_v45 = vadd.f32 %v2173_v32, %v2533_v38 }
 0x128   :  { %v588_v36 = vpop.f32.mrf.mxu0 }
 0x129   :  { %v776_v39 = vadd.f32 %v775_v33, %v708_v35  ;;  %v589_v40 = vadd.f32 %v2533_v38, %v588_v36  ;;  %v713_v54 = vmax.f32 %v597_v45, 0.0 }
 0x12a   :  { %v2174_v41 = vpop.f32.mrf.mxu0 }
 0x12b   :  { %v777_v43 = vadd.f32 %v776_v39, %v709_v37  ;;  %v711_v46 = vmax.f32 %v589_v40, 0.0  ;;  %v600_v51 = vadd.f32 %v2174_v41, %v2533_v38  ;;  %v762_v37 = vrot.slane %v2600_v57, 4 }
 0x12c   :  { %v591_v44 = vpop.f32.mrf.mxu0 }
 0x12d   :  { %v778_v47 = vadd.f32 %v777_v43, %v710_v42  ;;  %v592_v48 = vadd.f32 %v2533_v38, %v591_v44  ;;  %v714_v59 = vmax.f32 %v600_v51, 0.0 }
 0x12e   :  { %v2177_v49 = vpop.f32.mrf.mxu0 }
 0x12f   :  { %v779_v50 = vadd.f32 %v778_v47, %v711_v46  ;;  %v712_v52 = vmax.f32 %v592_v48, 0.0  ;;  %v613_v62 = vadd.f32 %v2177_v49, %v2533_v38  ;;  %v763_v47 = vadd.f32 %v762_v37, %v2600_v57  ;;  %v2259_v37 = vld [vmem:[%s2867_s4 + $0x10] sm:$0xff]  }
 0x130   :  { %v604_v53 = vpop.f32.mrf.mxu0 }
 0x131   :  { %v780_v55 = vadd.f32 %v779_v50, %v712_v52  ;;  %v605_v56 = vadd.f32 %v2533_v38, %v604_v53  ;;  %v717_v7 = vmax.f32 %v613_v62, 0.0 }
 0x132   :  { %v2178_v58 = vpop.f32.mrf.mxu0 }
 0x133   :  { %v781_v60 = vadd.f32 %v780_v55, %v713_v54  ;;  %v715_v63 = vmax.f32 %v605_v56, 0.0  ;;  %v616_v4 = vadd.f32 %v2178_v58, %v2533_v38  ;;  %v764_v55 = vrot.slane %v763_v47, 2 }
 0x134   :  { %v607_v61 = vpop.f32.mrf.mxu0 }
 0x135   :  { %v782_v0 = vadd.f32 %v781_v60, %v714_v59  ;;  %v608_v1 = vadd.f32 %v2533_v38, %v607_v61  ;;  %v718_v12 = vmax.f32 %v616_v4, 0.0  ;;  %v765_v62 = vadd.f32 %v764_v55, %v763_v47  ;;  %v2275_v47 = vld [vmem:[%s2867_s4 + $0x190] sm:$0xff]  }
 0x136   :  { %v2181_v2 = vpop.f32.mrf.mxu0 }
 0x137   :  { %v783_v3 = vadd.f32 %v782_v0, %v715_v63  ;;  %v716_v5 = vmax.f32 %v608_v1, 0.0  ;;  %v629_v15 = vadd.f32 %v2181_v2, %v2533_v38  ;;  %v766_v1 = vrot.slane %v765_v62, 1 }
 0x138   :  { %v620_v6 = vpop.f32.mrf.mxu0 }
 0x139   :  { %v784_v8 = vadd.f32 %v783_v3, %v716_v5  ;;  %v621_v9 = vadd.f32 %v2533_v38, %v620_v6  ;;  %v721_v24 = vmax.f32 %v629_v15, 0.0  ;;  %v767_v4 = vadd.f32 %v766_v1, %v765_v62 }
 0x13a   :  { %v2182_v11 = vpop.f32.mrf.mxu0 }
 0x13b   :  { %v785_v13 = vadd.f32 %v784_v8, %v717_v7  ;;  %v719_v16 = vmax.f32 %v621_v9, 0.0  ;;  %v632_v21 = vadd.f32 %v2182_v11, %v2533_v38  ;;  %v805_v8 = vmul.f32 0.00390625, %v767_v4 }
 0x13c   :  { %v623_v14 = vpop.f32.mrf.mxu0 }
 0x13d   :  { %v786_v17 = vadd.f32 %v785_v13, %v718_v12  ;;  %v624_v18 = vadd.f32 %v2533_v38, %v623_v14  ;;  %v722_v28 = vmax.f32 %v632_v21, 0.0  ;;  %v807_v12 = vpack.c.bf16 %v805_v8, %v805_v8  ;;  %v812_v21 = vld [vmem:[%s2866_s3 + $0x18] sm:$0xff]  ;;  %v2272_v8 = vld [vmem:[%s2867_s4 + $0xe0] sm:$0xff]  }
 0x13e   :  { %v2185_v19 = vpop.f32.mrf.mxu0 }
 0x13f   :  { %v787_v20 = vadd.f32 %v786_v17, %v719_v16  ;;  %v720_v22 = vmax.f32 %v624_v18, 0.0  ;;  %v645_v32 = vadd.f32 %v2185_v19, %v2533_v38  ;;  %v815_v14 = vunpack.c.l.b16 %v807_v12  ;;  %v811_v16 = vld [vmem:[%s2866_s3 + $0x10] sm:$0xff] }
 0x140   :  { %v636_v23 = vpop.f32.mrf.mxu0 }
 0x141   :  { %v788_v25 = vadd.f32 %v787_v20, %v720_v22  ;;  %v637_v26 = vadd.f32 %v2533_v38, %v636_v23  ;;  %v725_v43 = vmax.f32 %v645_v32, 0.0  ;;  %v1919_v20 = vcombine.high %v811_v16, %v811_v16  ;;  %v2252_v32 = vld [vmem:[%s2867_s4 + $0x60] sm:$0xff]  }
 0x142   :  { %v2186_v27 = vpop.f32.mrf.mxu0  ;;  %v1921_v23 = vcombine.high %v812_v21, %v812_v21 }
 0x143   :  { %v789_v29 = vadd.f32 %v788_v25, %v721_v24  ;;  %v723_v33 = vmax.f32 %v637_v26, 0.0  ;;  %v648_v40 = vadd.f32 %v2186_v27, %v2533_v38  ;;  %v1920_v24 = vcombine.low %v812_v21, %v812_v21  ;;  %v2244_v26 = vld [vmem:[%s2867_s4 + $0x78] sm:$0xff]   ;;  %v2280_v21 = vld [vmem:[%s2867_s4 + $0xd0] sm:$0xff]  }
 0x144   :  { %v639_v31 = vpop.f32.mrf.mxu0  ;;  %v2245_v27 = vld [vmem:[%s2867_s4 + $0x38] sm:$0xff]  }
 0x145   :  { %v790_v34 = vadd.f32 %v789_v29, %v722_v28  ;;  %v640_v35 = vadd.f32 %v2533_v38, %v639_v31  ;;  %v726_v48 = vmax.f32 %v648_v40, 0.0  ;;  %v864_v25 = vsel %vm844_vm2, %v1920_v24, 0  ;;  %v2248_v28 = vld [vmem:[%s2867_s4 + $0x70] sm:$0xff]   ;;  %v2251_v31 = vld [vmem:[%s2867_s4 + $0x28] sm:$0xff]  }
 0x146   :  { %v2189_v36 = vpop.f32.mrf.mxu0  ;;  %v2249_v29 = vld [vmem:[%s2867_s4 + $0x30] sm:$0xff]   ;;  %v2261_v40 = vld [vmem:[%s2867_s4 + $0x8] sm:$0xff]  }
 0x147   :  { %v791_v39 = vadd.f32 %v790_v34, %v723_v33  ;;  %v724_v41 = vmax.f32 %v640_v35, 0.0  ;;  %v661_v51 = vadd.f32 %v2189_v36, %v2533_v38  ;;  %v2253_v33 = vld [vmem:[%s2867_s4 + $0x20] sm:$0xff]   ;;  %v2254_v34 = vld [vmem:[%s2867_s4 + $0x58] sm:$0xff]   ;;  %v2258_v36 = vld [vmem:[%s2867_s4 + $0x50] sm:$0xff]  }
 0x148   :  { %v652_v42 = vpop.f32.mrf.mxu0  ;;  %v2255_v35 = vld [vmem:[%s2867_s4 + $0x18] sm:$0xff]  }
 0x149   :  { %v792_v44 = vadd.f32 %v791_v39, %v724_v41  ;;  %v653_v45 = vadd.f32 %v2533_v38, %v652_v42  ;;  %v729_v60 = vmax.f32 %v661_v51, 0.0  ;;  %v2260_v39 = vld [vmem:[%s2867_s4 + $0x48] sm:$0xff]   ;;  %v2262_v41 = vld [vmem:[%s2867_s4 + $0x40] sm:$0xff]  }
 0x14a   :  { %v2190_v46 = vpop.f32.mrf.mxu0  ;;  %v2263_v42 = vld [vmem:[%s2867_s4] sm:$0xff]  }
 0x14b   :  { %v793_v49 = vadd.f32 %v792_v44, %v725_v43  ;;  %v727_v52 = vmax.f32 %v653_v45, 0.0  ;;  %v664_v58 = vadd.f32 %v2190_v46, %v2533_v38  ;;  %v2264_v43 = vld [vmem:[%s2867_s4 + $0xf8] sm:$0xff]   ;;  %v2274_v46 = vld [vmem:[%s2867_s4 + $0x1d0] sm:$0xff]   ;;  %v2283_v51 = vld [vmem:[%s2867_s4 + $0x180] sm:$0xff]  }
 0x14c   :  { %v655_v50 = vpop.f32.mrf.mxu0  ;;  %v2266_v44 = vld [vmem:[%s2867_s4 + $0x1d8] sm:$0xff]  }
 0x14d   :  { %v794_v53 = vadd.f32 %v793_v49, %v726_v48  ;;  %v656_v54 = vadd.f32 %v2533_v38, %v655_v50  ;;  %v730_v63 = vmax.f32 %v664_v58, 0.0  ;;  %v1916_v38 = vcombine.low %v2558_v30, %v2558_v30  ;;  %v2267_v45 = vld [vmem:[%s2867_s4 + $0x198] sm:$0xff]   ;;  %2107 = vmatprep.subr.bf16.mxu0 %v2266_v44  ;;  %v2278_v48 = vld [vmem:[%s2867_s4 + $0x1c8] sm:$0xff]   ;;  %v2282_v50 = vld [vmem:[%s2867_s4 + $0x1c0] sm:$0xff]  }
 0x14e   :  { %v1918_v30 = vcombine.low %v811_v16, %v811_v16  ;;  %2108 = vmatpush3.bf16.msra.mxu0 %v2267_v45  ;;  %v2279_v49 = vld [vmem:[%s2867_s4 + $0x188] sm:$0xff]  }
 0x14f   :  { %v795_v56 = vadd.f32 %v794_v53, %v727_v52  ;;  %v728_v59 = vmax.f32 %v656_v54, 0.0  ;;  %v852_v19 = vsel %vm844_vm2, %v1916_v38, 0  ;;  %2109 = vmatprep.subr.bf16.mxu0 %v2274_v46  ;;  %v2349_v54 = vmov -1.0   ;;  %v2273_v38 = vld [vmem:[%s2867_s4 + $0xa0] sm:$0xff]  }
 0x150   :  { %v858_v22 = vsel %vm844_vm2, %v1918_v30, 0 }
 0x151   :  { %v796_v61 = vadd.f32 %v795_v56, %v728_v59 }
 0x152   :  { %2110 = vmatpush3.bf16.msra.mxu0 %v2275_v47  ;;  %v2287_v47 = vld [vmem:[%s2867_s4 + $0x80] sm:$0xff]  }
 0x153   :  { %v797_v0 = vadd.f32 %v796_v61, %v729_v60  ;;  %2111 = vmatprep.subr.bf16.mxu0 %v2278_v48  ;;  %v2265_v60 = vld [vmem:[%s2867_s4 + $0xb8] sm:$0xff]  }
 0x155   :  { %v798_v57 = vadd.f32 %v797_v0, %v730_v63  ;;  %v2268_v63 = vld [vmem:[%s2867_s4 + $0xf0] sm:$0xff]  }
 0x156   :  { %2112 = vmatpush3.bf16.msra.mxu0 %v2279_v49  ;;  %v2288_v49 = vld [vmem:[%s2867_s4 + $0x178] sm:$0xff]  }
 0x157   :  { %v799_v2 = vrot.slane %v798_v57, 4  ;;  %2113 = vmatprep.subr.bf16.mxu0 %v2282_v50 }
 0x159   :  { %v800_v3 = vadd.f32 %v799_v2, %v798_v57  ;;  %v2269_v57 = vld [vmem:[%s2867_s4 + $0xb0] sm:$0xff]   ;;  %v2270_v2 = vld [vmem:[%s2867_s4 + $0xe8] sm:$0xff]  }
 0x15a   :  { %2114 = vmatpush3.bf16.msra.mxu0 %v2283_v51 }
 0x15b   :  { %v801_v5 = vrot.slane %v800_v3, 2 }
 0x15d   :  { %v802_v6 = vadd.f32 %v801_v5, %v800_v3 }
 0x15f   :  { %v803_v7 = vrot.slane %v802_v6, 1 }
 0x161   :  { %v804_v9 = vadd.f32 %v803_v7, %v802_v6  ;;  %v2271_v6 = vld [vmem:[%s2867_s4 + $0xa8] sm:$0xff]  }
 0x163   :  { %v806_v11 = vmul.f32 0.00390625, %v804_v9 }
 0x165   :  { %v808_v13 = vpack.c.bf16 %v806_v11, %v806_v11  ;;  %v2350_v11 = vmov 1966171168  }
 0x166   :  { %v1070_v12 = vunpack.c.l.s4 %v2350_v11 }
 0x167   :  { %v816_v15 = vunpack.c.l.b16 %v808_v13  ;;  %v1072_v13 = vlaneseq }
 0x169   :  { %v818_v17 = vsel %vm817_vm3, %v816_v15, %v815_v14  ;;  %v2276_v15 = vld [vmem:[%s2867_s4 + $0xd8] sm:$0xff]  }
 0x16a   :  { %v819_v18 = vpack.c.b16 %v818_v17, %v818_v17  ;;  %v1071_v17 = vunpack.c.0.s8 %v1070_v12 }
 0x16c   :  { %1923 = vmatmul.mubr.msk.bf16.vlgmr.msra.gmra.mxu1 %vm840_vm4, %v819_v18 }
 0x16d   :  { %925 = vmatpush1.bf16.msra.mxu1 %v852_v19  ;;  %942 = vmatprep.mubr.bf16.mxu1 %v2348_v10  ;;  %v2277_v19 = vld [vmem:[%s2867_s4 + $0x98] sm:$0xff]  }
 0x16e   :  { %1926 = vmatprep.subr.msk.bf16.mxu1 %vm844_vm2, %v1919_v20 }
 0x174   :  { %1925 = vmatmul.mubr.msk.bf16.vlgmr.msra.gmra.mxu1 %vm840_vm4, %v819_v18 }
 0x175   :  { %966 = vmatpush1.bf16.msra.mxu1 %v858_v22  ;;  %983 = vmatprep.mubr.bf16.mxu1 %v2348_v10 }
 0x176   :  { %1928 = vmatprep.subr.msk.bf16.mxu1 %vm844_vm2, %v1921_v23 }
 0x17c   :  { %1927 = vmatmul.mubr.msk.bf16.vlgmr.msra.gmra.mxu1 %vm840_vm4, %v819_v18 }
 0x17d   :  { %1007 = vmatpush1.bf16.msra.mxu1 %v864_v25  ;;  %1024 = vmatprep.mubr.bf16.mxu1 %v2348_v10  ;;  %v2250_v10 = vld [vmem:[%s2867_s4 + $0x68] sm:$0xff]  }
 0x17e   :  { %2033 = vmatprep.subr.bf16.mxu1 %v2244_v26 }
 0x184   :  { %1929 = vmatmul.mubr.msk.bf16.vlgmr.msra.gmra.mxu1 %vm840_vm4, %v819_v18  ;;  %v1073_v18 = vshrl.u32 %v1072_v13, 7 }
 0x185   :  { %2034 = vmatpush3.bf16.msra.mxu1 %v2245_v27  ;;  %v2281_v27 = vld [vmem:[%s2867_s4 + $0x90] sm:$0xff]  }
 0x186   :  { %2035 = vmatprep.subr.bf16.mxu1 %v2248_v28  ;;  %v1074_v26 = vsub.s32 %v1071_v17, %v1073_v18 }
 0x189   :  { %2036 = vmatpush3.bf16.msra.mxu1 %v2249_v29 }
 0x18a   :  { %2037 = vmatprep.subr.bf16.mxu1 %v2250_v10  ;;  %v2284_v10 = vld [vmem:[%s2867_s4 + $0xc8] sm:$0xff]  }
 0x18d   :  { %2038 = vmatpush3.bf16.msra.mxu1 %v2251_v31 }
 0x18e   :  { %2039 = vmatprep.subr.bf16.mxu1 %v2252_v32 }
 0x191   :  { %2040 = vmatpush3.bf16.msra.mxu1 %v2253_v33 }
 0x192   :  { %2041 = vmatprep.subr.bf16.mxu1 %v2254_v34 }
 0x195   :  { %2042 = vmatpush3.bf16.msra.mxu1 %v2255_v35 }
 0x196   :  { %2043 = vmatprep.subr.bf16.mxu1 %v2258_v36 }
 0x199   :  { %2044 = vmatpush3.bf16.msra.mxu1 %v2259_v37 }
 0x19a   :  { %2045 = vmatprep.subr.bf16.mxu1 %v2260_v39 }
 0x19d   :  { %2046 = vmatpush3.bf16.msra.mxu1 %v2261_v40  ;;  %v2285_v40 = vld [vmem:[%s2867_s4 + $0x88] sm:$0xff]  }
 0x19e   :  { %2047 = vmatprep.subr.bf16.mxu1 %v2262_v41 }
 0x1a1   :  { %2048 = vmatpush3.bf16.msra.mxu1 %v2263_v42 }
 0x1a2   :  { %2055 = vmatprep.subr.bf16.mxu1 %v2264_v43  ;;  %v2286_v43 = vld [vmem:[%s2867_s4 + $0xc0] sm:$0xff]  }
 0x22c   :  { %v903_v52 = vpop.f32.mrf.mxu1 }
 0x22d   :  { %vm1033_vm5 = vcmp.ge.f32.partialorder %v903_v52, 0.0  ;;  %v2289_v52 = vld [vmem:[%s2867_s4 + $0x138] sm:$0xff]  }
 0x22e   :  { %v905_v53 = vpop.f32.mrf.mxu1  ;;  %v2737_v55 = vsel %vm1033_vm5, 1.0, %v2349_v54 }
 0x22f   :  { %vm1034_vm6 = vcmp.ge.f32.partialorder %v905_v53, 0.0  ;;  %v1049_v61 = vpack.c.bf16 %v2737_v55, %v2737_v55 }
 0x230   :  { %v2740_v56 = vsel %vm1034_vm6, 1.0, %v2349_v54  ;;  %v907_v58 = vpop.f32.mrf.mxu1 }
 0x231   :  { %v1050_v59 = vpack.c.bf16 %v2740_v56, %v2740_v56  ;;  %v1930_v25 = vpack.c.bf16 %v2740_v56, %v2737_v55  ;;  %v2290_v55 = vld [vmem:[%s2867_s4 + $0x170] sm:$0xff]  }
 0x232   :  { %v908_v62 = vpop.f32.mrf.mxu1  ;;  %v2291_v58 = vld [vmem:[%s2867_s4 + $0x130] sm:$0xff]  }
 0x233   :  { %1660 = vmatprep.mubr.bf16.mxu1 %v1050_v59  ;;  %v1075_v36 = vrot.slane %v1930_v25, %v1074_v26  ;;  %v2292_v59 = vld [vmem:[%s2867_s4 + $0x168] sm:$0xff]   ;;  %v2295_v62 = vld [vmem:[%s2867_s4 + $0x120] sm:$0xff]  }
 0x234   :  { %v944_v0 = vpop.f32.mrf.mxu1  ;;  %1661 = vmatmul.mubr.bf16.vlgmr.msra.gmra.mxu1 %v1049_v61  ;;  %v2294_v61 = vld [vmem:[%s2867_s4 + $0x160] sm:$0xff]  }
 0x235   :  { %2056 = vmatpush3.bf16.msra.mxu1 %v2265_v60  ;;  %vm1035_vm8 = vcmp.ge.f32.partialorder %v944_v0, 0.0  ;;  %v2293_v60 = vld [vmem:[%s2867_s4 + $0x128] sm:$0xff]   ;;  %v2297_v0 = vld [vmem:[%s2867_s4 + $0x118] sm:$0xff]  }
 0x236   :  { %v946_v1 = vpop.f32.mrf.mxu1  ;;  %2057 = vmatprep.subr.bf16.mxu1 %v2268_v63  ;;  %v1043_v20 = vsel %vm1035_vm8, 1.0, %v2349_v54  ;;  %v2296_v63 = vld [vmem:[%s2867_s4 + $0x158] sm:$0xff]  }
 0x237   :  { %vm1036_vm7 = vcmp.ge.f32.partialorder %v946_v1, 0.0  ;;  %v2299_v1 = vld [vmem:[%s2867_s4 + $0x110] sm:$0xff]  }
 0x238   :  { %v1044_v3 = vsel %vm1036_vm7, 1.0, %v2349_v54  ;;  %v948_v4 = vpop.f32.mrf.mxu1 }
 0x239   :  { %v1052_v5 = vpack.c.bf16 %v1044_v3, %v1044_v3  ;;  %2058 = vmatpush3.bf16.msra.mxu1 %v2269_v57  ;;  %v1931_v22 = vpack.c.bf16 %v1044_v3, %v1043_v20  ;;  %v2298_v57 = vld [vmem:[%s2867_s4 + $0x150] sm:$0xff]   ;;  %v2301_v3 = vld [vmem:[%s2867_s4 + $0x108] sm:$0xff]   ;;  %v2302_v4 = vld [vmem:[%s2867_s4 + $0x140] sm:$0xff]  }
 0x23a   :  { %v949_v7 = vpop.f32.mrf.mxu1  ;;  %2059 = vmatprep.subr.bf16.mxu1 %v2270_v2  ;;  %v2300_v2 = vld [vmem:[%s2867_s4 + $0x148] sm:$0xff]  }
 0x23b   :  { %1700 = vmatprep.mubr.bf16.mxu1 %v1052_v5  ;;  %v1082_v31 = vrot.slane %v1931_v22, %v1074_v26  ;;  %v2303_v5 = vld [vmem:[%s2867_s4 + $0x100] sm:$0xff]   ;;  %s2351_s4 = smov [#allocation2]  }
 0x23c   :  { %v985_v9 = vpop.f32.mrf.mxu1  ;;  %s1820_s2 = sshll.u32 %s2351_s4, 4  ;;  %s1821_s2 = int_to_ptr.vmem [resolvable:$true] %s1820_s2 }
 0x23d   :  { %2060 = vmatpush3.bf16.msra.mxu1 %v2271_v6  ;;  %vm1037_vm10 = vcmp.ge.f32.partialorder %v985_v9, 0.0  ;;  %v1097_v46 = vcombine.low %v1075_v36, %v1082_v31  ;;  %v1791_v31 = vand.u32 127, %v1072_v13  ;;  %s2304_s26 = scalar_lea.vmem %s1821_s2, 128  ;;  %p2309_p1 = scmp.lt.s32.totalorder %s1821_s2, %s1821_s2 }
 0x23e   :  { %v987_v14 = vpop.f32.mrf.mxu1  ;;  %2061 = vmatprep.subr.bf16.mxu1 %v2272_v8  ;;  %v2786_v28 = vsel %vm1037_vm10, 1.0, %v2349_v54  ;;  %p2305_p0 = scmp.ne.s32.totalorder %s1821_s2, %s2304_s26  ;;  %p2310_p2 = scmp.lt.s32.totalorder %s2304_s26, %s2304_s26 }
 0x23f   :  { %vm1038_vm9 = vcmp.ge.f32.partialorder %v987_v14, 0.0  ;;  %v1105_v50 = vrot.slane %v1097_v46, %v1074_v26  ;;  %v1053_v6 = vpack.c.bf16 %v2786_v28, %v2786_v28 }
 0x240   :  { %v989_v16 = vpop.f32.mrf.mxu1  ;;  %v1046_v23 = vsel %vm1038_vm9, 1.0, %v2349_v54  ;;  %p2311_p3 = por %p2310_p2, %p2309_p1 }
 0x241   :  { %2062 = vmatpush3.bf16.msra.mxu1 %v2273_v38  ;;  %v1932_v32 = vpack.c.bf16 %v1046_v23, %v2786_v28  ;;  %v1054_v56 = vpack.c.bf16 %v1046_v23, %v1046_v23 }
 0x242   :  { %v990_v30 = vpop.f32.mrf.mxu1  ;;  %2063 = vmatprep.subr.bf16.mxu1 %v2276_v15  ;;  %p2312_p4 = pnand %p2311_p3, %p2305_p0 }
 0x243   :  { %v1089_v44 = vrot.slane %v1932_v32, %v1074_v26 }
 0x244   :  { %v1026_v24 = vpop.f32.mrf.mxu1 }
 0x245   :  { %vm1039_vm11 = vcmp.ge.f32.partialorder %v1026_v24, 0.0  ;;  %2064 = vmatpush3.bf16.msra.mxu1 %v2277_v19 }
 0x246   :  { %v1028_v29 = vpop.f32.mrf.mxu1  ;;  %2065 = vmatprep.subr.bf16.mxu1 %v2280_v21  ;;  %v1047_v33 = vsel %vm1039_vm11, 1.0, %v2349_v54 }
 0x247   :  { %vm1040_vm12 = vcmp.ge.f32.partialorder %v1028_v29, 0.0  ;;  %v1055_v41 = vpack.c.bf16 %v1047_v33, %v1047_v33 }
 0x248   :  { %v1048_v34 = vsel %vm1040_vm12, 1.0, %v2349_v54  ;;  %v1030_v35 = vpop.f32.mrf.mxu1  ;;  %v1051_v54 = vpack.c.bf16 %v1043_v20, %v1043_v20 }
 0x249   :  { %v1056_v37 = vpack.c.bf16 %v1048_v34, %v1048_v34  ;;  %v1933_v39 = vpack.c.bf16 %v1048_v34, %v1047_v33  ;;  %2066 = vmatpush3.bf16.msra.mxu1 %v2281_v27 }
 0x24a   :  { %v1031_v42 = vpop.f32.mrf.mxu1  ;;  %2067 = vmatprep.subr.bf16.mxu1 %v2284_v10 }
 0x24b   :  { %v1096_v45 = vrot.slane %v1933_v39, %v1074_v26  ;;  %1780 = vmatprep.mubr.bf16.mxu0 %v1056_v37 }
 0x24c   :  { %1781 = vmatmul.mubr.bf16.vlgmr.msra.gmra.mxu0 %v1055_v41 }
 0x24d   :  { %2068 = vmatpush3.bf16.msra.mxu1 %v2285_v40  ;;  %v1098_v48 = vcombine.low %v1089_v44, %v1096_v45 }
 0x24e   :  { %2069 = vmatprep.subr.bf16.mxu1 %v2286_v43 }
 0x24f   :  { %v1112_v51 = vrot.slane %v1098_v48, %v1074_v26 }
 0x251   :  { %2070 = vmatpush3.bf16.msra.mxu1 %v2287_v47  ;;  %v1113_v53 = vcombine.low %v1105_v50, %v1112_v51 }
 0x252   :  { %2077 = vmatprep.subr.bf16.mxu1 %v2288_v49 }
 0x253   :  { %1115 = vst [vmem:[#allocation2] sm:$0xff] %v1113_v53 }
 0x254   :  { %1701 = vmatmul.mubr.bf16.vlgmr.msra.gmra.mxu1 %v1051_v54 }
 0x255   :  { %2078 = vmatpush3.bf16.msra.mxu1 %v2289_v52  ;;  %1740 = vmatprep.mubr.bf16.mxu1 %v1054_v56 }
 0x256   :  { %2079 = vmatprep.subr.bf16.mxu1 %v2290_v55 }
 0x259   :  { %2080 = vmatpush3.bf16.msra.mxu1 %v2291_v58 }
 0x25a   :  { %2081 = vmatprep.subr.bf16.mxu1 %v2292_v59 }
 0x25d   :  { %2082 = vmatpush3.bf16.msra.mxu1 %v2293_v60 }
 0x25e   :  { %2083 = vmatprep.subr.bf16.mxu1 %v2294_v61 }
 0x261   :  { %2084 = vmatpush3.bf16.msra.mxu1 %v2295_v62 }
 0x262   :  { %2085 = vmatprep.subr.bf16.mxu1 %v2296_v63 }
 0x265   :  { %2086 = vmatpush3.bf16.msra.mxu1 %v2297_v0 }
 0x266   :  { %2087 = vmatprep.subr.bf16.mxu1 %v2298_v57 }
 0x269   :  { %2088 = vmatpush3.bf16.msra.mxu1 %v2299_v1 }
 0x26a   :  { %2089 = vmatprep.subr.bf16.mxu1 %v2300_v2 }
 0x26d   :  { %2090 = vmatpush3.bf16.msra.mxu1 %v2301_v3 }
 0x26e   :  { %2091 = vmatprep.subr.bf16.mxu1 %v2302_v4 }
 0x271   :  { %2092 = vmatpush3.bf16.msra.mxu1 %v2303_v5 }
 0x274   :  { %1741 = vmatmul.mubr.bf16.vlgmr.msra.gmra.mxu1 %v1053_v6 }
 0x2f4   :  { %v2049_v7 = vpop.f32.mrf.mxu1 }
 0x2f6   :  { %v2050_v8 = vpop.f32.mrf.mxu1 }
 0x2f7   :  { %v2051_v21 = vadd.f32 %v2050_v8, %v2049_v7 }
 0x2f8   :  { %v2052_v9 = vpop.f32.mrf.mxu1 }
 0x2fa   :  { %v2053_v11 = vpop.f32.mrf.mxu1 }
 0x30c   :  { %v2115_v12 = vpop.f32.mrf.mxu0 }
 0x30e   :  { %v2116_v38 = vpop.f32.mrf.mxu0 }
 0x30f   :  { %v2117_v26 = vadd.f32 %v2116_v38, %v2115_v12 }
 0x310   :  { %v2118_v14 = vpop.f32.mrf.mxu0 }
 0x312   :  { %v2119_v15 = vpop.f32.mrf.mxu0 }
 0x314   :  { %v2071_v16 = vpop.f32.mrf.mxu1 }
 0x316   :  { %v2072_v17 = vpop.f32.mrf.mxu1 }
 0x317   :  { %v2073_v20 = vadd.f32 %v2072_v17, %v2071_v16 }
 0x318   :  { %v2074_v18 = vpop.f32.mrf.mxu1 }
 0x319   :  { %v1703_v23 = vadd.f32 %v2073_v20, %v2051_v21 }
 0x31a   :  { %v2075_v19 = vpop.f32.mrf.mxu1 }
 0x334   :  { %v2093_v30 = vpop.f32.mrf.mxu1 }
 0x336   :  { %v2094_v22 = vpop.f32.mrf.mxu1 }
 0x337   :  { %v2095_v24 = vadd.f32 %v2094_v22, %v2093_v30 }
 0x338   :  { %v2096_v25 = vpop.f32.mrf.mxu1 }
 0x339   :  { %v1743_v27 = vadd.f32 %v2095_v24, %v1703_v23 }
 0x33a   :  { %v2097_v28 = vpop.f32.mrf.mxu1 }
 0x33b   :  { %v1783_v29 = vadd.f32 %v2117_v26, %v1743_v27 }
 0x33d   :  { %v1792_v10 = vsel %vm1788_vm13, %v1783_v29, -inf  ;;  %1789 = vst.msk [vmem:[#allocation4] sm:$0x3] %vm1788_vm13, %v1783_v29 }
 0x33e   :  { %1793 = vmax.xlane.f32.xlu0 %v1792_v10 }
 0x3c7   :  { %v1794_v32 = vpop.xlane.xlu0 %1793 }
 0x3c8   :  { %vm1795_vm14 = vcmp.eq.f32.partialorder %v1783_v29, %v1794_v32 }
 0x3c9   :  { %v1796_v33 = vsel %vm1795_vm14, %v1791_v31, 10 }
 0x3ca   :  { %v1797_v34 = vsel %vm1788_vm13, %v1796_v33, 2147483647 }
 0x3cb   :  { %v1799_v35 = vshra.s32 %v1797_v34, 16  ;;  %v1798_v37 = vand.u32 65535, %v1797_v34 }
 0x3cd   :  { %v1801_v36 = vcvt.s32.f32 %v1799_v35  ;;  %v1800_v40 = vcvt.s32.f32 %v1798_v37 }
 0x3cf   :  { %1802 = vmin.xlane.f32.xlu0 %v1801_v36 }
 0x458   :  { %v1803_v39 = vpop.xlane.xlu0 %1802 }
 0x459   :  { %vm1804_vm15 = vcmp.eq.f32.partialorder %v1801_v36, %v1803_v39 }
 0x45a   :  { %v1805_v41 = vsel %vm1804_vm15, %v1800_v40, inf }
 0x45b   :  { %1806 = vmin.xlane.f32.xlu1 %v1805_v41 }
 0x45c   :  { %2315 = shalt.err (!%p2312_p4)
}
 0x45d   :  { %1823 = dma.vmem_to_hbm [thread:$0]  %s1821_s2, 128, %s2868_s5, [#allocation3]  }
 0x45e   :  { %s2324_s29 = scalar_lea.vmem %s1831_s25, 32  ;;  %p2329_p6 = scmp.lt.s32.totalorder %s1831_s25, %s1831_s25 }
 0x45f   :  { %p2325_p5 = scmp.ne.s32.totalorder %s1831_s25, %s2324_s29  ;;  %p2330_p7 = scmp.lt.s32.totalorder %s2324_s29, %s2324_s29 }
 0x461   :  { %p2331_p8 = por %p2330_p7, %p2329_p6 }
 0x463   :  { %p2332_p9 = pnand %p2331_p8, %p2325_p5 }
 0x465   :  { %2335 = shalt.err (!%p2332_p9)
}
 0x466   :  { %1833 = dma.vmem_to_hbm [thread:$0]  %s1831_s25, 32, %s2869_s6, [#allocation5]   ;;  %v1809_v13 = vcvt.f32.s32 %v1803_v39  ;;  %vm1812_vm0 = vcmask 1024  }
 0x468   :  { %v1810_v43 = vshll.u32 %v1809_v13, 16 }
 0x4e4   :  { %v1807_v42 = vpop.xlane.xlu1 %1806 }
 0x4e5   :  { %v1808_v44 = vcvt.f32.s32 %v1807_v42 }
 0x4e7   :  { %v1811_v45 = vadd.s32 %v1810_v43, %v1808_v44 }
 0x4e9   :  { %1813 = vst.msk [vmem:[%s2870_s7] sm:$0x3] %vm1812_vm0, %v1811_v45 }
 0x4ea   :  { %2344 = dma.done.wait [#allocation3], 128  }
 0x4eb   :  { %2345 = vsyncadd [#allocation3], 4294967168 }
 0x4ec   :  { %2346 = dma.done.wait [#allocation5], 32  }
 0x4ed   :  { %2347 = vsyncadd [#allocation5], 4294967264 }
 0x4ee   :  { %1844 = vsyncpa [#allocation3], 1 }
 0x4ef   :  { %1845 = vsyncpa [#allocation5], 1 }

</bundles_post_ra>
